<compile_context>
chip_gen: v6e
topology: v6e:2x2x1
jax: 0.10.0
libtpu: 0.0.40
codegen_flags: <defaults>
</compile_context>

<pallas_src>
import jax
import jax.numpy as jnp
from jax.experimental import pallas as pl
from jax.experimental.pallas import tpu as pltpu


# --------------------------------------------------------------------------- #
# Kernel
# --------------------------------------------------------------------------- #
def film_kernel(gamma_ref, x_ref, o_ref):
    # gamma_ref: (1, C, T) f32 — batch-resident (one DMA per batch index).
    # x_ref / o_ref: (1, C, TILE_F, T) — streamed per (batch, F-tile).
    gamma = gamma_ref[0].astype(x_ref.dtype)               # (C, T)
    x_b = x_ref[0]                                         # (C, TILE_F, T)
    # beta == gamma (reference-module behaviour), so gamma*x + beta
    # == gamma * (x + 1): one broadcast, one add, one mul, in x's dtype.
    o_ref[0] = ((x_b + 1.0) * gamma[:, None, :]).astype(o_ref.dtype)


# --------------------------------------------------------------------------- #
# Tiling helpers
# --------------------------------------------------------------------------- #
def _sublane_multiple(dtype):
    """Packed-sublane multiple for the F (second-minor) block dim."""
    return {4: 8, 2: 16, 1: 32}.get(jnp.dtype(dtype).itemsize, 8)


def _default_tile_target_bytes():
    """~2 MiB on v5e (16 MiB default scoped VMEM), ~4 MiB on v6e/v7x."""
    try:
        kind = jax.devices()[0].device_kind.lower()
    except Exception:  # pragma: no cover - defensive
        kind = ""
    if "v5 lite" in kind or "v5e" in kind or "v5litepod" in kind:
        return 2 * 1024 * 1024
    return 4 * 1024 * 1024


def _pick_tile_f(F_, C, T, dtype, target_bytes):
    """Pick TILE_F: a sublane multiple (dtype-aware) with tile <= target_bytes.
    Does NOT need to divide F_ (grid uses cdiv; partial block is masked)."""
    sub = _sublane_multiple(dtype)
    itemsize = jnp.dtype(dtype).itemsize
    bytes_per_f_row = max(1, C * T * itemsize)
    target_rows = max(1, target_bytes // bytes_per_f_row)
    tile = max(sub, (target_rows // sub) * sub)
    if tile >= F_:
        # Whole F axis in one block (block dim == full array dim is always
        # legal, and it is the *smaller* choice here — never a VMEM blow-up).
        return F_
    return tile


# --------------------------------------------------------------------------- #
# Wrapper
# --------------------------------------------------------------------------- #
def film_layer_2d(x, sfm, weight, bias, n_channels, *, tile_f=None,
                  tile_target_bytes=None):
    """x: (B, C, F, T), sfm: (B, C_sfm, T), weight: (2C, C_sfm), bias: (2C,)."""
    B, C, F_, T = x.shape
    assert C == n_channels
    assert sfm.shape[0] == B and sfm.shape[2] == T

    # FiLM generator Linear, precomputed in the wrapper (tiny vs the x stream):
    # gamma[b] = W_g @ sfm[b] + b_g, using only the first n_channels rows —
    # the reference takes both gamma and beta from that same slice.
    w_g = weight[:n_channels].astype(jnp.float32)              # (C, C_sfm)
    b_g = bias[:n_channels].astype(jnp.float32)                # (C,)
    gamma = (jnp.einsum("oc,bct->bot", w_g, sfm.astype(jnp.float32))
             + b_g[None, :, None])                             # (B, C, T) f32

    if tile_target_bytes is None:
        tile_target_bytes = _default_tile_target_bytes()
    if tile_f is None:
        tile_f = _pick_tile_f(F_, C, T, x.dtype, tile_target_bytes)
    sub = _sublane_multiple(x.dtype)
    assert tile_f == F_ or tile_f % sub == 0, (tile_f, F_, sub)

    grid = (B, pl.cdiv(F_, tile_f))

    itemsize = jnp.dtype(x.dtype).itemsize
    tile_bytes = tile_f * C * T * itemsize
    gamma_bytes = C * T * 4
    # 2 double-buffered x tiles in + 2 out + resident gamma (double-buffered)
    # + headroom; clamp into [8 MiB, 64 MiB] (v7x physical VMEM is 64 MiB).
    vmem_budget = 4 * tile_bytes + 2 * gamma_bytes + (2 << 20)
    vmem_limit = int(min(max(vmem_budget, 8 << 20), 64 << 20))

    cost = pl.CostEstimate(
        flops=2 * B * C * F_ * T,                  # one add + one mul per elem
        transcendentals=0,
        bytes_accessed=2 * x.size * itemsize + gamma.size * 4,
    )

    out = pl.pallas_call(
        film_kernel,
        out_shape=jax.ShapeDtypeStruct(x.shape, x.dtype),
        grid=grid,
        in_specs=[
            # gamma depends only on the batch index -> resident across F tiles.
            pl.BlockSpec((1, C, T), lambda b, f: (b, 0, 0)),
            pl.BlockSpec((1, C, tile_f, T), lambda b, f: (b, 0, f, 0)),
        ],
        out_specs=pl.BlockSpec((1, C, tile_f, T), lambda b, f: (b, 0, f, 0)),
        compiler_params=pltpu.CompilerParams(
            dimension_semantics=("parallel", "parallel"),
            vmem_limit_bytes=vmem_limit),
        cost_estimate=cost,
    )(gamma, x)
    return out


# --------------------------------------------------------------------------- #
# Plain-JAX reference (mirrors the PyTorch forward, incl. beta == gamma)
# --------------------------------------------------------------------------- #
def reference(x, sfm, weight, bias, n_channels):
    sfm_t = jnp.transpose(sfm, (0, 2, 1))                      # (B, T, C_sfm)
    film = sfm_t @ weight.T + bias                             # (B, T, 2C)
    film = jnp.transpose(film, (0, 2, 1))                      # (B, 2C, T)
    gamma = film[:, :n_channels, :][:, :, None, :]             # (B, C, 1, T)
    beta = film[:, :n_channels, :][:, :, None, :]              # same slice
    return gamma * x + beta


if __name__ == "__main__":
    key = jax.random.PRNGKey(0)
    kx, ks, kw, kb, kx2, ks2 = jax.random.split(key, 6)

    # --- Case 1: shapes consistent with AutoEncoder(in_channels=16): first
    # FiLM sees C = bottleneckdim = 16 channels; F=16 freq bins, T=128 frames.
    B, C, F_, T = 2, 16, 16, 128
    sfm_dim = 8
    x = jax.random.normal(kx, (B, C, F_, T), dtype=jnp.float32)
    sfm = jax.random.normal(ks, (B, sfm_dim, T), dtype=jnp.float32)
    bound = 1.0 / (sfm_dim ** 0.5)
    weight = jax.random.uniform(kw, (2 * C, sfm_dim), jnp.float32, -bound, bound)
    bias = jax.random.uniform(kb, (2 * C,), jnp.float32, -bound, bound)

    out = film_layer_2d(x, sfm, weight, bias, C, tile_f=8)   # grid=(2, 2)
    out = jax.block_until_ready(out)
    ref = reference(x, sfm, weight, bias, C)
    assert out.shape == (B, C, F_, T)
    assert jnp.allclose(out, ref, atol=1e-5, rtol=1e-5), "mismatch (case 1)"

    # --- Case 2: ragged shapes — T not a multiple of 128 (no wrapper pad:
    # masked lane stores) and F not a multiple of the tile (cdiv grid: partial
    # last F block masked by Pallas).
    F2, T2 = 12, 100
    x2 = jax.random.normal(kx2, (B, C, F2, T2), dtype=jnp.float32)
    sfm2 = jax.random.normal(ks2, (B, sfm_dim, T2), dtype=jnp.float32)
    out2 = film_layer_2d(x2, sfm2, weight, bias, C, tile_f=8)  # grid=(2, 2)
    out2 = jax.block_until_ready(out2)
    ref2 = reference(x2, sfm2, weight, bias, C)
    assert out2.shape == (B, C, F2, T2)
    assert jnp.allclose(out2, ref2, atol=1e-5, rtol=1e-5), "mismatch (case 2)"

    # --- Case 3: auto tile picker (no explicit tile_f).
    out3 = film_layer_2d(x, sfm, weight, bias, C)
    out3 = jax.block_until_ready(out3)
    assert jnp.allclose(out3, ref, atol=1e-5, rtol=1e-5), "mismatch (case 3)"

    print("KERNEL_OK")
</pallas_src>

<mosaic_0001>
module attributes {stable_mosaic.version = 11 : i64} {
  func.func @film_kernel(%arg0: i32, %arg1: i32, %arg2: memref<1x16x128xf32, #tpu.memory_space<vmem>>, %arg3: memref<1x16x8x128xf32, #tpu.memory_space<vmem>>, %arg4: memref<1x16x8x128xf32, #tpu.memory_space<vmem>>) attributes {dimension_semantics = [#tpu.dimension_semantics<parallel>, #tpu.dimension_semantics<parallel>], iteration_bounds = array<i64: 2, 2>, scalar_prefetch = 0 : i64, scratch_operands = 0 : i64, tpu.core_type = #tpu.core_type<tc>, window_params = [{transform_indices = @transform_0, window_bounds = array<i64: 1, 16, 128>}, {transform_indices = @transform_1, window_bounds = array<i64: 1, 16, 8, 128>}, {transform_indices = @transform_2, window_bounds = array<i64: 1, 16, 8, 128>}]} {
    %c0 = arith.constant 0 : index
    %c0_0 = arith.constant 0 : index
    %c0_1 = arith.constant 0 : index
    %0 = vector.load %arg2[%c0, %c0_0, %c0_1] : memref<1x16x128xf32, #tpu.memory_space<vmem>>, vector<1x16x128xf32>
    %1 = vector.shape_cast %0 : vector<1x16x128xf32> to vector<16x128xf32>
    %c0_2 = arith.constant 0 : index
    %c0_3 = arith.constant 0 : index
    %c0_4 = arith.constant 0 : index
    %c0_5 = arith.constant 0 : index
    %2 = vector.load %arg3[%c0_2, %c0_3, %c0_4, %c0_5] : memref<1x16x8x128xf32, #tpu.memory_space<vmem>>, vector<1x16x8x128xf32>
    %3 = vector.shape_cast %2 : vector<1x16x8x128xf32> to vector<16x8x128xf32>
    %cst = arith.constant 1.000000e+00 : f32
    %4 = vector.broadcast %cst : f32 to vector<16x8x128xf32>
    %5 = arith.addf %3, %4 : vector<16x8x128xf32>
    %6 = vector.shape_cast %1 : vector<16x128xf32> to vector<16x1x128xf32>
    %7 = vector.broadcast %6 : vector<16x1x128xf32> to vector<16x8x128xf32>
    %8 = arith.mulf %5, %7 : vector<16x8x128xf32>
    %c0_6 = arith.constant 0 : index
    %c0_7 = arith.constant 0 : index
    %c0_8 = arith.constant 0 : index
    %c0_9 = arith.constant 0 : index
    %9 = vector.load %arg4[%c0_6, %c0_7, %c0_8, %c0_9] : memref<1x16x8x128xf32, #tpu.memory_space<vmem>>, vector<1x16x8x128xf32>
    %10 = vector.shape_cast %9 : vector<1x16x8x128xf32> to vector<16x8x128xf32>
    %11 = vector.shape_cast %8 : vector<16x8x128xf32> to vector<1x16x8x128xf32>
    tpu.vector_store %arg4[%c0_6, %c0_7, %c0_8, %c0_9], %11 {strides = array<i32>} : memref<1x16x8x128xf32, #tpu.memory_space<vmem>>, vector<1x16x8x128xf32>,
    return
  }
  func.func @transform_0(%arg0: i32, %arg1: i32) -> (i32, i32, i32) {
    %c0_i32 = arith.constant 0 : i32
    %c0_i32_0 = arith.constant 0 : i32
    %c0_i32_1 = arith.constant 0 : i32
    return %arg0, %c0_i32, %c0_i32_0 : i32, i32, i32
  }
  func.func @transform_1(%arg0: i32, %arg1: i32) -> (i32, i32, i32, i32) {
    %c0_i32 = arith.constant 0 : i32
    %c0_i32_0 = arith.constant 0 : i32
    %c0_i32_1 = arith.constant 0 : i32
    return %arg0, %c0_i32, %arg1, %c0_i32_0 : i32, i32, i32, i32
  }
  func.func @transform_2(%arg0: i32, %arg1: i32) -> (i32, i32, i32, i32) {
    %c0_i32 = arith.constant 0 : i32
    %c0_i32_0 = arith.constant 0 : i32
    %c0_i32_1 = arith.constant 0 : i32
    return %arg0, %c0_i32, %arg1, %c0_i32_0 : i32, i32, i32, i32
  }
}

</mosaic_0001>

<bundles_post_ra>
// kernel: tpu_custom_call.1
= control target key start
LH: loop header
LB: loop body
LE: loop exit
PB: predicated region body
PF: predicated region fallthrough
CT: control target
= control target key end

     0   :  { %s1268_s0 = inlined_call_operand.hbm [shape: f32[2,16,128], index: 0, kind: input, shape index: {}]   ;;  %s1269_s1 = inlined_call_operand.hbm [shape: f32[2,16,16,128], index: 1, kind: input, shape index: {}]   ;;  %s1270_s2 = inlined_call_operand.hbm [shape: f32[2,16,16,128], index: 2, kind: output, shape index: {}]  }
   0x1   :  { %1280 = sst [smem:[#allocation16_spill]] %s1268_s0 }
   0x2   :  { %1281 = sst [smem:[#allocation17_spill]] %s1270_s2 }
   0x3   :  { %7 = vsyncpa [#allocation3], 0 }
   0x4   :  { %9 = vsyncpa [#allocation3 + $0x1], 0 }
   0x5   :  { %10 = vsyncpa [#allocation6], 0 }
   0x6   :  { %12 = vsyncpa [#allocation6 + $0x1], 0 }
   0x7   :  { %13 = vsyncpa [#allocation4], 0 }
   0x8   :  { %15 = vsyncpa [#allocation4 + $0x1], 0  ;;  %s934_s9 = smov 0   ;;  %s936_s10 = smov 0  }
   0x9   :  { %s938_s11 = smov 0   ;;  %s940_s12 = smov 0  }
   0xa   :  { %s942_s13 = smov 0   ;;  %s944_s14 = smov 0  }
   0xb   :  { %s946_s15 = smov 0   ;;  %s948_s16 = smov 0  }
   0xc   :  { %s950_s17 = smov 0   ;;  %s952_s18 = smov 0  }
   0xd   :  { %s954_s19 = smov 0  }
   0xe LB: > { %1282 = sst [smem:[#allocation11_spill]] %s867_s9  ;;  %s591_s20 = sadd.s32 4294967295, %s907_s19   ;;  %s907_s19 = sphi %s954_s19, %s21_s19   ;;  %s903_s18 = sphi %s952_s18, %s1316_s18   ;;  %s899_s17 = sphi %s950_s17, %s1315_s17   ;;  %s895_s16 = sphi %s948_s16, %s1314_s16   ;;  %s891_s15 = sphi %s946_s15, %s1313_s15   ;;  %s887_s14 = sphi %s944_s14, %s1312_s14   ;;  %s883_s13 = sphi %s942_s13, %s1311_s13   ;;  %s879_s12 = sphi %s940_s12, %s1310_s12   ;;  %s875_s11 = sphi %s938_s11, %s1309_s11   ;;  %s871_s10 = sphi %s936_s10, %s1308_s10   ;;  %s867_s9 = sphi %s934_s9, %s1307_s9  }
   0xf   : > { %1283 = sst [smem:[#allocation12_spill]] %s891_s15  ;;  %s33_s21 = sadd.s32 1, %s903_s18 }
  0x10   : > { %s40_s22 = sadd.s32 1, %s887_s14  ;;  %p47_p0 = scmp.ne.s32.totalorder %s887_s14, %s883_s13 }
  0x11   : > { %p48_p1 = scmp.eq.s32.totalorder %s907_s19, 0  ;;  %p53_p2 = scmp.ne.s32.totalorder %s883_s13, %s879_s12 }
  0x12   : > { %p996_p3 = scmp.eq.s32.totalorder %s591_s20, 0  ;;  %p628_p5 = scmp.lt.s32.totalorder %s907_s19, 4 }
  0x13   : > { %p49_p4 = por %p48_p1, %p47_p0  ;;  %s133_s25 = sand.u32 1, %s887_s14  }
  0x14   : > { %p1005_p6 = por %p996_p3, %p53_p2  ;;  %s595_s26 = sshll.u32 %s133_s25, 4 }
  0x15   : > { %s610_s27 = sshll.u32 %s903_s18, 8  ;;  %s1286_s0 = sld [smem:[#allocation16_spill]] }
  0x16   : > { %s137_s3 = scalar_lea.vmem [#allocation2], %s595_s26  ;;  %p1016_p7 = pnand %p628_p5, %p49_p4 }
  0x17   : > { %s144_s4 = sshll.u32 %s137_s3, 4  ;;  %p601_p8 = scmp.ge.s32.totalorder %s907_s19, 1  ;;  %s145_s4 = int_to_ptr.vmem [resolvable:$true] %s144_s4 }
  0x18   : > { %s134_s6 = scalar_lea.sflag [#allocation3], %s133_s25  ;;  %p729_p9 = pneg %p1016_p7 }
  0x19   : > { %s740_s7 = scalar_lea.vmem %s145_s4, 256  ;;  %s909_s8 = smov [#allocation2]  }
  0x1a   : > { %p741_p10 = scmp.ne.s32.totalorder %s145_s4, %s740_s7  ;;  %s745_s12 = sshll.u32 %s909_s8, 4  ;;  %s746_s12 = int_to_ptr.vmem [resolvable:$false] %s745_s12 }
  0x1b   : > { %s143_s30 = scalar_lea.hbm %s1286_s0, %s610_s27  ;;  %s747_s26 = scalar_lea.vmem %s746_s12, 512 }
  0x1c   : > { %p743_p11 = pnand %p741_p10, %p729_p9  ;;  %p748_p13 = scmp.lt.s32.totalorder %s145_s4, %s746_s12 }
  0x1d   : > { %p749_p0 = scmp.lt.s32.totalorder %s747_s26, %s740_s7 }
  0x1e   : > { %p744_p12 = pneg %p743_p11 }
  0x1f   : > { %p750_p2 = por %p749_p0, %p748_p13 }
  0x21   : > { %p751_p4 = pnand %p750_p2, %p744_p12 }
  0x23   : > { %754 = shalt.err (!%p751_p4)
}
  0x24   : > { %s1271_s27 = smov 128   ;;  %s1272_s25 = smov 8  }
  0x25   : > { %620 = dma.hbm_to_vmem [thread:$0]  (!%p1016_p7), %s143_s30, 256, %s145_s4, %s134_s6, %s1271_s27, %s1271_s27, %s1272_s25  }
  0x26   : > { %p174_p9 = scmp.lt.s32.totalorder %s907_s19, 5  ;;  %s592_s29 = sadd.s32 4294967294, %s907_s19  }
  0x27   : > { %s30_s3 = sadd.s32 1, %s899_s17  ;;  %s68_s7 = sadd.s32 1, %s875_s11 }
  0x28   : > { %p1031_p10 = pnand %p601_p8, %p174_p9  ;;  %p31_p11 = scmp.ge.s32.totalorder %s30_s3, 2 }
  0x29   : > { %p75_p12 = scmp.ne.s32.totalorder %s875_s11, %s871_s10  ;;  %p81_p13 = scmp.ne.s32.totalorder %s871_s10, %s867_s9 }
  0x2a   : > { %s1318_s3 = smov (%p31_p11, %s30_s3), 0  ;;  %s1320_s21 = smov (!%p31_p11, %s33_s21), %s903_s18 }
  0x2b   : > { %1289 = sst [smem:[#allocation13_spill]] %s1318_s3  ;;  %s64_s30 = ssub.s32 %s899_s17, %s1318_s3 }
  0x2c   : > { %p1051_p7 = por %p75_p12, %p48_p1  ;;  %p35_p8 = scmp.ge.s32.totalorder %s1320_s21, 2 }
  0x2d   : > { %p1057_p0 = por %p81_p13, %p996_p3  ;;  %p107_p2 = scmp.eq.s32.totalorder %s591_s20, 3 }
  0x2e   : > { %p113_p4 = scmp.eq.s32.totalorder %s592_s29, 3  ;;  %s1322_s21 = smov (%p35_p8, %s1320_s21), 0 }
  0x2f   : > { %p1065_p9 = por %p107_p2, %p75_p12  ;;  %s37_s23 = ssub.s32 %s903_s18, %s1322_s21 }
  0x30   : > { %p1069_p1 = por %p113_p4, %p81_p13  ;;  %s154_s12 = sand.u32 1, %s875_s11  }
  0x31   : > { %s1292_s6 = scalar_select %p1065_p9, 1, 0 }
  0x32   : > { %s1294_s8 = scalar_select %p1069_p1, 1, 0 }
  0x33   : > { %1293 = sst [smem:[#allocation14_spill]] %s1292_s6  ;;  %p38_p3 = scmp.eq.s32.totalorder %s37_s23, 0 }
  0x34   : > { %1295 = sst [smem:[#allocation15_spill]] %s1294_s8  ;;  %s65_s26 = sor.u32 %s64_s30, %s37_s23 }
  0x35   : > { %p66_p11 = scmp.eq.s32.totalorder %s65_s26, 0  ;;  %s598_s27 = sshll.u32 %s154_s12, 7 }
  0x36   : > { %s1079_s20 = scalar_select %p38_p3, %s887_s14, %s40_s22  }
  0x37   : > { %s1082_s29 = scalar_select %p66_p11, %s875_s11, %s68_s7  }
  0x38   : > { %s599_s25 = sshll.u32 %s903_s18, 5  ;;  %s158_s9 = scalar_lea.vmem [#allocation5], %s598_s27 }
  0x39   : > { %s163_s0 = sadd.s32 %s899_s17, %s599_s25  ;;  %s166_s2 = sshll.u32 %s158_s9, 4  ;;  %s167_s2 = int_to_ptr.vmem [resolvable:$true] %s166_s2 }
  0x3a   : > { %s600_s3 = sshll.u32 %s163_s0, 7  ;;  %p1093_p12 = pnand %p628_p5, %p1051_p7 }
  0x3b   : > { %s165_s15 = scalar_lea.hbm %s1269_s1, %s600_s3  ;;  %s155_s22 = scalar_lea.sflag [#allocation6], %s154_s12 }
  0x3c   : > { %p757_p13 = pneg %p1093_p12  ;;  %s768_s7 = scalar_lea.vmem %s167_s2, 2048 }
  0x3d   : > { %p769_p8 = scmp.ne.s32.totalorder %s167_s2, %s768_s7  ;;  %s912_s0 = smov [#allocation5]  }
  0x3e   : > { %s773_s9 = sshll.u32 %s912_s0, 4  ;;  %s774_s9 = int_to_ptr.vmem [resolvable:$false] %s773_s9 }
  0x3f   : > { %p771_p2 = pnand %p769_p8, %p757_p13  ;;  %s775_s27 = scalar_lea.vmem %s774_s9, 4096 }
  0x40   : > { %p776_p3 = scmp.lt.s32.totalorder %s167_s2, %s774_s9  ;;  %p777_p11 = scmp.lt.s32.totalorder %s775_s27, %s768_s7 }
  0x41   : > { %p772_p4 = pneg %p771_p2 }
  0x42   : > { %p778_p1 = por %p777_p11, %p776_p3 }
  0x44   : > { %p779_p9 = pnand %p778_p1, %p772_p4 }
  0x46   : > { %782 = shalt.err (!%p779_p9)
}
  0x47   : > { %s913_s25 = smov 256   ;;  %s1297_s3 = smov 8  }
  0x48   : > { %s1298_s4 = smov 128   ;;  %178 = sbr.rel (%p1031_p10) target bundleno = 127 (0x7f), region = 28 }
  0x49   : > { %623 = dma.hbm_to_vmem [thread:$0]  (!%p1093_p12), %s165_s15, 2048, %s167_s2, %s155_s22, %s913_s25, %s1298_s4, %s1297_s3  }
  0x4a   : > { %s180_s6 = sand.u32 (!%p1031_p10), 1, %s883_s13  }
  0x4b   : > { %s1106_s8 = sshll.u32 (!%p1031_p10), %s180_s6, 4  ;;  %s181_s23 = scalar_lea.sflag (!%p1031_p10), [#allocation3], %s180_s6 }
  0x4c   : > { %s184_s12 = scalar_lea.vmem (!%p1031_p10), [#allocation2], %s1106_s8 }
  0x4d   : > { %854 = dma.done.wait (%p1005_p6), %s181_s23, 256  }
  0x4e   : > { %856 = vsyncadd (%p1005_p6), %s181_s23, 4294967040  ;;  %s1114_s26 = sand.u32 1, %s871_s10  }
  0x4f   : > { %s603_s2 = sshll.u32 %s1114_s26, 7  ;;  %s190_s15 = scalar_lea.sflag [#allocation6], %s1114_s26 }
  0x50   : > { %s1120_s28 = scalar_lea.vmem [#allocation5], %s603_s2 }
  0x51   : > { %858 = dma.done.wait (%p1057_p0), %s190_s15, 2048  }
  0x52   : > { %860 = vsyncadd (%p1057_p0), %s190_s15, 4294965248  ;;  %v259_v0 = vlaneseq  ;;  %v914_v1 = vmov 1966171168   ;;  %v219_v6 = vld [vmem:[%s184_s12] sm:$0xff]  ;;  %v222_v9 = vld [vmem:[%s1120_s28 + $0x8] sm:$0xff]  ;;  %s1160_s24 = scalar_lea.vmem [#allocation7], %s603_s2 }
  0x53   : > { %v257_v2 = vunpack.c.l.s4 %v914_v1  ;;  %v221_v7 = vld [vmem:[%s1120_s28] sm:$0xff]  ;;  %v238_v12 = vadd.f32 1.0, %v222_v9  ;;  %v223_v13 = vld [vmem:[%s1120_s28 + $0x10] sm:$0xff]  ;;  %v224_v14 = vld [vmem:[%s1120_s28 + $0x18] sm:$0xff]  ;;  %v255_v16 = vcombine.high %v219_v6, %v219_v6  ;;  %s1299_s5 = sld [smem:[#allocation12_spill]]  ;;  %s606_s30 = sshll.u32 %s895_s16, 5 }
  0x54   : > { %v260_v3 = vshrl.u32 %v259_v0, 7  ;;  %v237_v10 = vadd.f32 1.0, %v221_v7  ;;  %v225_v15 = vld [vmem:[%s1120_s28 + $0x20] sm:$0xff]  ;;  %v239_v17 = vadd.f32 1.0, %v223_v13  ;;  %v240_v18 = vadd.f32 1.0, %v224_v14  ;;  %v226_v20 = vld [vmem:[%s1120_s28 + $0x28] sm:$0xff] }
  0x55   : > { %v258_v4 = vunpack.c.0.s8 %v257_v2  ;;  %v241_v19 = vadd.f32 1.0, %v225_v15  ;;  %v227_v21 = vld [vmem:[%s1120_s28 + $0x30] sm:$0xff]  ;;  %v228_v22 = vld [vmem:[%s1120_s28 + $0x38] sm:$0xff]  ;;  %v242_v26 = vadd.f32 1.0, %v226_v20  ;;  %v229_v28 = vld [vmem:[%s1120_s28 + $0x40] sm:$0xff]  ;;  %s480_s16 = sshll.u32 %s1160_s24, 4  ;;  %s1198_s16 = int_to_ptr.vmem [resolvable:$true] %s480_s16 }
  0x56   : > { %v1131_v8 = vsub.s32 0, %v260_v3  ;;  %v220_v27 = vld [vmem:[%s184_s12 + $0x8] sm:$0xff]  ;;  %v243_v30 = vadd.f32 1.0, %v227_v21  ;;  %v244_v31 = vadd.f32 1.0, %v228_v22  ;;  %v245_v32 = vadd.f32 1.0, %v229_v28  ;;  %v231_v50 = vld [vmem:[%s1120_s28 + $0x50] sm:$0xff] }
  0x57   : > { %v1126_v5 = vsub.s32 %v258_v4, %v260_v3  ;;  %v230_v29 = vld [vmem:[%s1120_s28 + $0x48] sm:$0xff]  ;;  %v232_v59 = vld [vmem:[%s1120_s28 + $0x58] sm:$0xff]  ;;  %v247_v63 = vadd.f32 1.0, %v231_v50  ;;  %v233_v13 = vld [vmem:[%s1120_s28 + $0x60] sm:$0xff]  ;;  %s1300_s7 = sld [smem:[#allocation14_spill]]  ;;  %s466_s4 = scalar_lea.sflag [#allocation4], %s1114_s26 }
  0x58   : > { %v246_v40 = vadd.f32 1.0, %v230_v29  ;;  %v236_v22 = vld [vmem:[%s1120_s28 + $0x78] sm:$0xff]  ;;  %s1301_s25 = sld [smem:[#allocation17_spill]]  ;;  %s783_s6 = scalar_lea.vmem %s1198_s16, 2048 }
  0x59   : > { %v262_v11 = vrot.slane %v219_v6, %v1126_v5  ;;  %v269_v25 = vrot.slane %v255_v16, %v1126_v5  ;;  %v311_v33 = vrot.slane %v220_v27, %v1126_v5  ;;  %v248_v6 = vadd.f32 1.0, %v232_v59  ;;  %v234_v16 = vld [vmem:[%s1120_s28 + $0x68] sm:$0xff]  ;;  %s477_s22 = sadd.s32 %s1299_s5, %s606_s30  ;;  %p784_p5 = scmp.ne.s32.totalorder %s1198_s16, %s783_s6 }
  0x5a   : > { %v252_v28 = vadd.f32 1.0, %v236_v22  ;;  %s607_s0 = sshll.u32 %s477_s22, 7  ;;  %s915_s8 = smov [#allocation7]  }
  0x5b   : > { %v278_v23 = vrot.slane %v262_v11, %v1126_v5  ;;  %v270_v24 = vcombine.high %v262_v11, %v262_v11  ;;  %v285_v37 = vrot.slane %v269_v25, %v1126_v5  ;;  %v271_v38 = vcombine.high %v269_v25, %v269_v25  ;;  %s787_s23 = sshll.u32 %s915_s8, 4  ;;  %s788_s23 = int_to_ptr.vmem [resolvable:$false] %s787_s23 }
  0x5c   : > { %v327_v39 = vrot.slane %v311_v33, %v1126_v5  ;;  %v319_v41 = vcombine.high %v311_v33, %v311_v33  ;;  %v304_v11 = vcombine.high %v220_v27, %v220_v27  ;;  %s789_s12 = scalar_lea.vmem %s788_s23, 4096  ;;  %p790_p0 = scmp.lt.s32.totalorder %s1198_s16, %s788_s23 }
  0x5d   : > { %v356_v34 = vrot.slane %v278_v23, %v1131_v8  ;;  %v292_v35 = vrot.slane %v270_v24, %v1126_v5  ;;  %v300_v36 = vcombine.high %v278_v23, %v278_v23  ;;  %v372_v46 = vrot.slane %v285_v37, %v1131_v8  ;;  %p1302_p6 = scmp.ne.s32.totalorder %s1300_s7, 0  ;;  %p791_p9 = scmp.lt.s32.totalorder %s789_s12, %s783_s6 }
  0x5e   : > { %v299_v47 = vrot.slane %v271_v38, %v1126_v5  ;;  %v301_v48 = vcombine.high %v285_v37, %v285_v37  ;;  %v388_v49 = vrot.slane %v327_v39, %v1131_v8  ;;  %v341_v54 = vrot.slane %v319_v41, %v1126_v5  ;;  %s1203_s3 = scalar_lea.hbm %s1301_s25, %s607_s0 }
  0x5f   : > { %v433_v42 = vmul.f32 %v356_v34, %v237_v10  ;;  %v360_v43 = vrot.slane %v292_v35, %v1131_v8  ;;  %v364_v44 = vrot.slane %v300_v36, %v1131_v8  ;;  %v302_v45 = vcombine.high %v292_v35, %v292_v35  ;;  %p785_p10 = pnand %p784_p5, %p1302_p6  ;;  %p792_p1 = por %p791_p9, %p790_p0 }
  0x60   : > { %v437_v55 = vmul.f32 %v372_v46, %v241_v19  ;;  %v376_v56 = vrot.slane %v299_v47, %v1131_v8  ;;  %v380_v57 = vrot.slane %v301_v48, %v1131_v8  ;;  %v303_v58 = vcombine.high %v299_v47, %v299_v47 }
  0x61   : > { %449 = vst [vmem:[%s1160_s24] sm:$0xff] %v433_v42  ;;  %v434_v51 = vmul.f32 %v360_v43, %v238_v12  ;;  %v435_v52 = vmul.f32 %v364_v44, %v239_v17  ;;  %v368_v53 = vrot.slane %v302_v45, %v1131_v8  ;;  %v441_v61 = vmul.f32 %v388_v49, %v245_v32  ;;  %p786_p7 = pneg %p785_p10 }
  0x62   : > { %v392_v62 = vrot.slane %v341_v54, %v1131_v8  ;;  %453 = vst [vmem:[%s1160_s24 + $0x20] sm:$0xff] %v437_v55  ;;  %v438_v0 = vmul.f32 %v376_v56, %v242_v26  ;;  %v439_v1 = vmul.f32 %v380_v57, %v243_v30  ;;  %v384_v2 = vrot.slane %v303_v58, %v1131_v8 }
  0x63   : > { %450 = vst [vmem:[%s1160_s24 + $0x8] sm:$0xff] %v434_v51  ;;  %451 = vst [vmem:[%s1160_s24 + $0x10] sm:$0xff] %v435_v52  ;;  %v436_v60 = vmul.f32 %v368_v53, %v240_v18  ;;  %v349_v3 = vcombine.high %v327_v39, %v327_v39  ;;  %v351_v7 = vcombine.high %v341_v54, %v341_v54  ;;  %v235_v18 = vld [vmem:[%s1120_s28 + $0x70] sm:$0xff]  ;;  %v249_v19 = vadd.f32 1.0, %v233_v13  ;;  %p793_p12 = pnand %p792_p1, %p786_p7 }
  0x64   : > { %457 = vst [vmem:[%s1160_s24 + $0x40] sm:$0xff] %v441_v61  ;;  %v442_v4 = vmul.f32 %v392_v62, %v246_v40  ;;  %454 = vst [vmem:[%s1160_s24 + $0x28] sm:$0xff] %v438_v0  ;;  %v440_v9 = vmul.f32 %v384_v2, %v244_v31  ;;  %v318_v15 = vrot.slane %v304_v11, %v1126_v5  ;;  %v250_v23 = vadd.f32 1.0, %v234_v16 }
  0x65   : > { %452 = vst [vmem:[%s1160_s24 + $0x18] sm:$0xff] %v436_v60  ;;  %455 = vst [vmem:[%s1160_s24 + $0x30] sm:$0xff] %v439_v1  ;;  %v396_v10 = vrot.slane %v349_v3, %v1131_v8  ;;  %v400_v12 = vrot.slane %v351_v7, %v1131_v8  ;;  %v251_v26 = vadd.f32 1.0, %v235_v18 }
  0x66   : > { %458 = vst [vmem:[%s1160_s24 + $0x48] sm:$0xff] %v442_v4  ;;  %456 = vst [vmem:[%s1160_s24 + $0x38] sm:$0xff] %v440_v9  ;;  %v334_v20 = vrot.slane %v318_v15, %v1126_v5  ;;  %v320_v21 = vcombine.high %v318_v15, %v318_v15 }
  0x67   : > { %v443_v14 = vmul.f32 %v396_v10, %v247_v63  ;;  %v444_v17 = vmul.f32 %v400_v12, %v248_v6 }
  0x68   : > { %v404_v24 = vrot.slane %v334_v20, %v1131_v8  ;;  %v348_v25 = vrot.slane %v320_v21, %v1126_v5  ;;  %v350_v27 = vcombine.high %v334_v20, %v334_v20 }
  0x69   : > { %459 = vst [vmem:[%s1160_s24 + $0x50] sm:$0xff] %v443_v14  ;;  %460 = vst [vmem:[%s1160_s24 + $0x58] sm:$0xff] %v444_v17 }
  0x6a   : > { %v445_v29 = vmul.f32 %v404_v24, %v249_v19  ;;  %v408_v30 = vrot.slane %v348_v25, %v1131_v8  ;;  %v412_v31 = vrot.slane %v350_v27, %v1131_v8  ;;  %v352_v32 = vcombine.high %v348_v25, %v348_v25 }
  0x6c   : > { %461 = vst [vmem:[%s1160_s24 + $0x60] sm:$0xff] %v445_v29  ;;  %v446_v33 = vmul.f32 %v408_v30, %v250_v23  ;;  %v447_v34 = vmul.f32 %v412_v31, %v251_v26  ;;  %v416_v5 = vrot.slane %v352_v32, %v1131_v8 }
  0x6e   : > { %462 = vst [vmem:[%s1160_s24 + $0x68] sm:$0xff] %v446_v33  ;;  %463 = vst [vmem:[%s1160_s24 + $0x70] sm:$0xff] %v447_v34  ;;  %v448_v35 = vmul.f32 %v416_v5, %v252_v28 }
  0x70   : > { %464 = vst [vmem:[%s1160_s24 + $0x78] sm:$0xff] %v448_v35 }
  0x71   : > { %796 = shalt.err (!%p793_p12)
}
  0x72   : > { %s797_s2 = scalar_lea.hbm %s1203_s3, 2048  ;;  %s801_s24 = scalar_lea.hbm %s1301_s25, 8192 }
  0x73   : > { %p798_p13 = scmp.ne.s32.totalorder %s1203_s3, %s797_s2  ;;  %p802_p4 = scmp.lt.s32.totalorder %s1203_s3, %s1301_s25 }
  0x74   : > { %p803_p3 = scmp.lt.s32.totalorder %s801_s24, %s797_s2 }
  0x75   : > { %p799_p8 = pnand %p798_p13, %p1302_p6 }
  0x76   : > { %p804_p11 = por %p803_p3, %p802_p4 }
  0x77   : > { %p800_p2 = pneg %p799_p8 }
  0x79   : > { %p805_p5 = pnand %p804_p11, %p800_p2 }
  0x7b   : > { %808 = shalt.err (!%p805_p5)
}
  0x7c   : > { %s916_s22 = smov 128   ;;  %s917_s0 = smov 256  }
  0x7d   : > { %s918_s9 = smov 8  }
  0x7e   : > { %615 = dma.vmem_to_hbm [thread:$0]  (%p1302_p6), %s1198_s16, 2048, %s1203_s3, %s466_s4, %s916_s22, %s917_s0, %s918_s9  }
  0x7f PF: > { %s1303_s27 = sld [smem:[#allocation11_spill]]  ;;  %p629_p10 = scmp.ge.s32.totalorder %s907_s19, 2 }
  0x80   : > { %s1304_s6 = sld [smem:[#allocation15_spill]] }
  0x85   : > { %s495_s8 = sand.u32 1, %s1303_s27  }
  0x86   : > { %p1305_p7 = scmp.ne.s32.totalorder %s1304_s6, 0  ;;  %s496_s23 = scalar_lea.sflag [#allocation4], %s495_s8 }
  0x88   : > { %p625_p0 = pnand %p629_p10, %p1305_p7 }
  0x8a   : > { %p626_p9 = pneg %p625_p0 }
  0x8c   : > { %862 = dma.done.wait (%p626_p9), %s496_s23, 2048  }
  0x8d   : > { %864 = vsyncadd (%p626_p9), %s496_s23, 4294965248  ;;  %s21_s19 = sadd.s32 1, %s907_s19   ;;  %s1306_s26 = sld [smem:[#allocation13_spill]] }
  0x8e   : > { %p18_p1 = scmp.ge.s32.totalorder %s21_s19, 6   ;;  %s1307_s9 = smov %s871_s10 }
  0x8f   : > { %s1308_s10 = smov %s875_s11  ;;  %s1309_s11 = smov %s1082_s29 }
  0x90   : > { %s1310_s12 = smov %s883_s13  ;;  %s1311_s13 = smov %s887_s14 }
  0x91   : > { %s1312_s14 = smov %s1079_s20  ;;  %s1313_s15 = smov %s899_s17 }
  0x92   : > { %s1314_s16 = smov %s903_s18  ;;  %s1316_s18 = smov %s1322_s21 }
  0x93   : > { %s1315_s17 = smov %s1306_s26  ;;  %20 = sbr.rel (!%p18_p1) target bundleno = 14 (0xe), region = 86 }
  0x98   :  { %501 = vsyncpa [#allocation3], 1 }
  0x99   :  { %503 = vsyncpa [#allocation3 + $0x1], 1 }
  0x9a   :  { %504 = vsyncpa [#allocation6], 1 }
  0x9b   :  { %506 = vsyncpa [#allocation6 + $0x1], 1 }
  0x9c   :  { %507 = vsyncpa [#allocation4], 1 }
  0x9d   :  { %509 = vsyncpa [#allocation4 + $0x1], 1 }

</bundles_post_ra>
